<compile_context>
chip_gen: v6e
topology: v6e:2x2x1
jax: 0.10.0
libtpu: 0.0.40
codegen_flags: <defaults>
</compile_context>

<pallas_src>
import jax
import jax.numpy as jnp
from jax.experimental import pallas as pl
from jax.experimental.pallas import tpu as pltpu


LANE = 128               # lane width; output head zero-padded to this (unmasked stores)
SUBLANE = 16             # batch rows padded to this for clean layout
TARGET_TB = 1024         # batch tile target (sweep 1024/2048; ~86% HBM roofline at 1024)
MIN_ROWS_PER_STEP = 256  # don't split the grid below this many rows per step


def _round_up(x, m):
    return ((x + m - 1) // m) * m


def _choose_tb(b_pad):
    """Batch tile: big enough to amortize per-step overhead, but capped so the
    grid has >=2 steps when there is enough work (v7x dual-TensorCore)."""
    if b_pad >= 2 * MIN_ROWS_PER_STEP:
        return min(TARGET_TB, _round_up(pl.cdiv(b_pad, 2), SUBLANE))
    return min(TARGET_TB, b_pad)


def _mlp_kernel(x_ref, w1_ref, b1_ref, w2_ref, b2_ref, w3_ref, b3_ref, o_ref):
    # x arrives as f32; cast the VMEM tile to bf16 right before the MXU.
    x_bf = x_ref[...].astype(jnp.bfloat16)

    # --- layer 1: linear(1024 -> 256) + ReLU (bf16 MXU operands, f32 accumulate) ---
    h = jnp.dot(x_bf, w1_ref[...], preferred_element_type=jnp.float32)
    h = jnp.maximum(h + b1_ref[...], 0.0)           # bias add + ReLU in f32 (VPU)
    # dropout(0.5): eval-mode identity

    # --- layer 2: linear(256 -> 128) + tanh ---
    h = jnp.dot(h.astype(jnp.bfloat16), w2_ref[...],
                preferred_element_type=jnp.float32)
    h = jnp.tanh(h + b2_ref[...])                   # f32 tanh (EUP)

    # --- output head: linear(128 -> num_classes padded to LANE) ---
    o = jnp.dot(h.astype(jnp.bfloat16), w3_ref[...],
                preferred_element_type=jnp.float32)
    o_ref[...] = (o + b3_ref[...]).astype(o_ref.dtype)


def prepare_params(params):
    """One-time prep outside the per-call path: bf16 MXU weight casts and
    zero-padding of the output head to a lane-dense LANE columns."""
    w1, b1, w2, b2, w3, b3 = params
    num_classes = w3.shape[1]
    nc_pad = _round_up(num_classes, LANE)
    w3p = jnp.pad(w3, ((0, 0), (0, nc_pad - num_classes))).astype(jnp.bfloat16)
    b3p = jnp.pad(b3, ((0, 0), (0, nc_pad - num_classes)))
    prepared = (w1.astype(jnp.bfloat16), b1,
                w2.astype(jnp.bfloat16), b2,
                w3p, b3p)
    return prepared, num_classes


def fully_connected_forward(x, prepared, num_classes):
    """x: [B, C, H, W] float32. Returns logits [B, num_classes] (float32)."""
    w1, b1, w2, b2, w3, b3 = prepared
    B = x.shape[0]
    x_flat = x.reshape(B, -1)                       # matches PyTorch x.view(B, -1)
    in_features = x_flat.shape[1]
    h1 = w1.shape[1]
    h2 = w2.shape[1]
    nc_pad = w3.shape[1]

    # Pad batch only to the sublane multiple (16), NOT to a TB multiple; the
    # ragged last grid step is handled by the cdiv grid (masked output writes,
    # and padding rows are independent per-row work that gets sliced off).
    b_pad = _round_up(max(B, 1), SUBLANE)
    if b_pad != B:
        x_flat = jnp.pad(x_flat, ((0, b_pad - B), (0, 0)))

    tb = _choose_tb(b_pad)
    grid = (pl.cdiv(b_pad, tb),)

    resident = lambda i: (0, 0)   # constant index_map -> weights stay VMEM-resident

    cost = pl.CostEstimate(
        flops=2 * b_pad * (in_features * h1 + h1 * h2 + h2 * nc_pad),
        transcendentals=b_pad * h2,                  # tanh
        bytes_accessed=(b_pad * in_features * 4                          # x (f32)
                        + (in_features * h1 + h1 * h2 + h2 * nc_pad) * 2  # bf16 weights
                        + (h1 + h2 + nc_pad) * 4                          # f32 biases
                        + b_pad * nc_pad * 4),                            # f32 output
    )

    out = pl.pallas_call(
        _mlp_kernel,
        out_shape=jax.ShapeDtypeStruct((b_pad, nc_pad), jnp.float32),
        grid=grid,
        in_specs=[
            pl.BlockSpec((tb, in_features), lambda i: (i, 0)),   # x: batch-tiled (f32)
            pl.BlockSpec((in_features, h1), resident),           # w1 (bf16)
            pl.BlockSpec((1, h1), resident),                     # b1 (f32)
            pl.BlockSpec((h1, h2), resident),                    # w2 (bf16)
            pl.BlockSpec((1, h2), resident),                     # b2 (f32)
            pl.BlockSpec((h2, nc_pad), resident),                # w3 (bf16, padded)
            pl.BlockSpec((1, nc_pad), resident),                 # b3 (f32, padded)
        ],
        out_specs=pl.BlockSpec((tb, nc_pad), lambda i: (i, 0)),  # lane-dense output slab
        compiler_params=pltpu.CompilerParams(
            dimension_semantics=("parallel",),       # shard grid steps across v7x's 2 TCs
        ),
        cost_estimate=cost,
    )(x_flat, w1, b1, w2, b2, w3, b3)

    return out[:B, :num_classes]


def init_params(key, input_size, hidden1, hidden2, num_classes):
    """Deterministic PyTorch-Linear-style init (uniform(-1/sqrt(fan_in), 1/sqrt(fan_in)))."""
    ks = jax.random.split(key, 6)

    def lin(kw, kb, fan_in, fan_out):
        bound = 1.0 / (fan_in ** 0.5)
        w = jax.random.uniform(kw, (fan_in, fan_out), jnp.float32, -bound, bound)
        b = jax.random.uniform(kb, (1, fan_out), jnp.float32, -bound, bound)
        return w, b

    w1, b1 = lin(ks[0], ks[1], input_size, hidden1)
    w2, b2 = lin(ks[2], ks[3], hidden1, hidden2)
    w3, b3 = lin(ks[4], ks[5], hidden2, num_classes)
    return (w1, b1, w2, b2, w3, b3)


def _reference_forward(x, params):
    """Pure-JAX f32 reference for correctness checking."""
    w1, b1, w2, b2, w3, b3 = params
    h = x.reshape(x.shape[0], -1)
    h = jnp.maximum(h @ w1 + b1, 0.0)
    h = jnp.tanh(h @ w2 + b2)
    return h @ w3 + b3


if __name__ == "__main__":
    key = jax.random.PRNGKey(0)
    k_x, k_p = jax.random.split(key)

    B, C, H, W = 2, 4, 16, 16
    input_size = C * H * W                     # 1024
    hidden1, hidden2, num_classes = 256, 128, 10

    x = jax.random.normal(k_x, (B, C, H, W), jnp.float32)
    params = init_params(k_p, input_size, hidden1, hidden2, num_classes)

    prepared, nc = prepare_params(params)      # one-time bf16 cast + head padding
    out = fully_connected_forward(x, prepared, nc)
    out = jax.block_until_ready(out)

    ref = _reference_forward(x, params)
    assert out.shape == (B, num_classes)
    # Tolerance loosened vs. the f32 reference because MXU operands are bf16
    # (f32 accumulation) over a K=1024 contraction.
    assert jnp.allclose(out, ref, atol=2e-2, rtol=2e-2), "mismatch vs JAX reference"

    print("KERNEL_OK")
</pallas_src>

<mosaic_0001>
module attributes {stable_mosaic.version = 11 : i64} {
  func.func @_mlp_kernel(%arg0: i32, %arg1: memref<16x1024xf32, #tpu.memory_space<vmem>>, %arg2: memref<1024x256xbf16, #tpu.memory_space<vmem>>, %arg3: memref<1x256xf32, #tpu.memory_space<vmem>>, %arg4: memref<256x128xbf16, #tpu.memory_space<vmem>>, %arg5: memref<1x128xf32, #tpu.memory_space<vmem>>, %arg6: memref<128x128xbf16, #tpu.memory_space<vmem>>, %arg7: memref<1x128xf32, #tpu.memory_space<vmem>>, %arg8: memref<16x128xf32, #tpu.memory_space<vmem>>) attributes {dimension_semantics = [#tpu.dimension_semantics<parallel>], iteration_bounds = array<i64: 1>, scalar_prefetch = 0 : i64, scratch_operands = 0 : i64, tpu.core_type = #tpu.core_type<tc>, window_params = [{transform_indices = @transform_0, window_bounds = array<i64: 16, 1024>}, {pipeline_mode = #tpu.pipeline_mode<synchronous>, transform_indices = @transform_1, window_bounds = array<i64: 1024, 256>}, {pipeline_mode = #tpu.pipeline_mode<synchronous>, transform_indices = @transform_2, window_bounds = array<i64: 1, 256>}, {pipeline_mode = #tpu.pipeline_mode<synchronous>, transform_indices = @transform_3, window_bounds = array<i64: 256, 128>}, {pipeline_mode = #tpu.pipeline_mode<synchronous>, transform_indices = @transform_4, window_bounds = array<i64: 1, 128>}, {pipeline_mode = #tpu.pipeline_mode<synchronous>, transform_indices = @transform_5, window_bounds = array<i64: 128, 128>}, {pipeline_mode = #tpu.pipeline_mode<synchronous>, transform_indices = @transform_6, window_bounds = array<i64: 1, 128>}, {transform_indices = @transform_7, window_bounds = array<i64: 16, 128>}]} {
    %c0 = arith.constant 0 : index
    %c0_0 = arith.constant 0 : index
    %0 = vector.load %arg1[%c0, %c0_0] : memref<16x1024xf32, #tpu.memory_space<vmem>>, vector<16x1024xf32>
    %1 = arith.truncf %0 : vector<16x1024xf32> to vector<16x1024xbf16>
    %c0_1 = arith.constant 0 : index
    %c0_2 = arith.constant 0 : index
    %2 = vector.load %arg2[%c0_1, %c0_2] : memref<1024x256xbf16, #tpu.memory_space<vmem>>, vector<1024x256xbf16>
    %cst = arith.constant dense<0.000000e+00> : vector<16x256xf32>
    %3 = tpu.matmul %1, %2, %cst {dimension_numbers = #tpu.dot_dimension_numbers<[1], [0], [0], [1], [0, 0, 1, 1], [], []>} : vector<16x1024xbf16>, vector<1024x256xbf16>, vector<16x256xf32> -> vector<16x256xf32>
    %c0_3 = arith.constant 0 : index
    %c0_4 = arith.constant 0 : index
    %4 = vector.load %arg3[%c0_3, %c0_4] : memref<1x256xf32, #tpu.memory_space<vmem>>, vector<1x256xf32>
    %5 = vector.broadcast %4 : vector<1x256xf32> to vector<16x256xf32>
    %6 = arith.addf %3, %5 : vector<16x256xf32>
    %cst_5 = arith.constant 0.000000e+00 : f32
    %7 = vector.broadcast %cst_5 : f32 to vector<16x256xf32>
    %8 = arith.maximumf %6, %7 : vector<16x256xf32>
    %9 = arith.truncf %8 : vector<16x256xf32> to vector<16x256xbf16>
    %c0_6 = arith.constant 0 : index
    %c0_7 = arith.constant 0 : index
    %10 = vector.load %arg4[%c0_6, %c0_7] : memref<256x128xbf16, #tpu.memory_space<vmem>>, vector<256x128xbf16>
    %cst_8 = arith.constant dense<0.000000e+00> : vector<16x128xf32>
    %11 = tpu.matmul %9, %10, %cst_8 {dimension_numbers = #tpu.dot_dimension_numbers<[1], [0], [0], [1], [0, 0, 1, 1], [], []>} : vector<16x256xbf16>, vector<256x128xbf16>, vector<16x128xf32> -> vector<16x128xf32>
    %c0_9 = arith.constant 0 : index
    %c0_10 = arith.constant 0 : index
    %12 = vector.load %arg5[%c0_9, %c0_10] : memref<1x128xf32, #tpu.memory_space<vmem>>, vector<1x128xf32>
    %13 = vector.broadcast %12 : vector<1x128xf32> to vector<16x128xf32>
    %14 = arith.addf %11, %13 : vector<16x128xf32>
    %15 = math.tanh %14 : vector<16x128xf32>
    %16 = arith.truncf %15 : vector<16x128xf32> to vector<16x128xbf16>
    %c0_11 = arith.constant 0 : index
    %c0_12 = arith.constant 0 : index
    %17 = vector.load %arg6[%c0_11, %c0_12] : memref<128x128xbf16, #tpu.memory_space<vmem>>, vector<128x128xbf16>
    %cst_13 = arith.constant dense<0.000000e+00> : vector<16x128xf32>
    %18 = tpu.matmul %16, %17, %cst_13 {dimension_numbers = #tpu.dot_dimension_numbers<[1], [0], [0], [1], [0, 0, 1, 1], [], []>} : vector<16x128xbf16>, vector<128x128xbf16>, vector<16x128xf32> -> vector<16x128xf32>
    %c0_14 = arith.constant 0 : index
    %c0_15 = arith.constant 0 : index
    %19 = vector.load %arg7[%c0_14, %c0_15] : memref<1x128xf32, #tpu.memory_space<vmem>>, vector<1x128xf32>
    %20 = vector.broadcast %19 : vector<1x128xf32> to vector<16x128xf32>
    %21 = arith.addf %18, %20 : vector<16x128xf32>
    %c0_16 = arith.constant 0 : index
    %c0_17 = arith.constant 0 : index
    %22 = vector.load %arg8[%c0_16, %c0_17] : memref<16x128xf32, #tpu.memory_space<vmem>>, vector<16x128xf32>
    tpu.vector_store %arg8[%c0_16, %c0_17], %21 {strides = array<i32>} : memref<16x128xf32, #tpu.memory_space<vmem>>, vector<16x128xf32>,
    return
  }
  func.func @transform_0(%arg0: i32) -> (i32, i32) {
    %c0_i32 = arith.constant 0 : i32
    %c0_i32_0 = arith.constant 0 : i32
    return %arg0, %c0_i32 : i32, i32
  }
  func.func @transform_1(%arg0: i32) -> (i32, i32) {
    %c0_i32 = arith.constant 0 : i32
    %c0_i32_0 = arith.constant 0 : i32
    %c0_i32_1 = arith.constant 0 : i32
    return %c0_i32, %c0_i32_0 : i32, i32
  }
  func.func @transform_2(%arg0: i32) -> (i32, i32) {
    %c0_i32 = arith.constant 0 : i32
    %c0_i32_0 = arith.constant 0 : i32
    %c0_i32_1 = arith.constant 0 : i32
    return %c0_i32, %c0_i32_0 : i32, i32
  }
  func.func @transform_3(%arg0: i32) -> (i32, i32) {
    %c0_i32 = arith.constant 0 : i32
    %c0_i32_0 = arith.constant 0 : i32
    %c0_i32_1 = arith.constant 0 : i32
    return %c0_i32, %c0_i32_0 : i32, i32
  }
  func.func @transform_4(%arg0: i32) -> (i32, i32) {
    %c0_i32 = arith.constant 0 : i32
    %c0_i32_0 = arith.constant 0 : i32
    %c0_i32_1 = arith.constant 0 : i32
    return %c0_i32, %c0_i32_0 : i32, i32
  }
  func.func @transform_5(%arg0: i32) -> (i32, i32) {
    %c0_i32 = arith.constant 0 : i32
    %c0_i32_0 = arith.constant 0 : i32
    %c0_i32_1 = arith.constant 0 : i32
    return %c0_i32, %c0_i32_0 : i32, i32
  }
  func.func @transform_6(%arg0: i32) -> (i32, i32) {
    %c0_i32 = arith.constant 0 : i32
    %c0_i32_0 = arith.constant 0 : i32
    %c0_i32_1 = arith.constant 0 : i32
    return %c0_i32, %c0_i32_0 : i32, i32
  }
  func.func @transform_7(%arg0: i32) -> (i32, i32) {
    %c0_i32 = arith.constant 0 : i32
    %c0_i32_0 = arith.constant 0 : i32
    return %arg0, %c0_i32 : i32, i32
  }
}

</mosaic_0001>

<bundles_post_ra>
// kernel: tpu_custom_call.1
= control target key start
LH: loop header
LB: loop body
LE: loop exit
PB: predicated region body
PF: predicated region fallthrough
CT: control target
= control target key end

     0   :  { %12 = vsyncpa [#allocation3], 0  ;;  %s2013_s0 = inlined_call_operand.hbm [shape: f32[16,1024], index: 0, kind: input, shape index: {}]   ;;  %s2014_s1 = inlined_call_operand.hbm [shape: bf16[1024,256], index: 1, kind: input, shape index: {}]   ;;  %s2015_s2 = inlined_call_operand.vmem [shape: f32[1,256], index: 2, kind: input, shape index: {}]   ;;  %s2016_s3 = inlined_call_operand.hbm [shape: bf16[256,128], index: 3, kind: input, shape index: {}]   ;;  %s2017_s4 = inlined_call_operand.vmem [shape: f32[1,128], index: 4, kind: input, shape index: {}]   ;;  %s2018_s5 = inlined_call_operand.hbm [shape: bf16[128,128], index: 5, kind: input, shape index: {}]   ;;  %s2019_s6 = inlined_call_operand.vmem [shape: f32[1,128], index: 6, kind: input, shape index: {}]   ;;  %s2020_s7 = inlined_call_operand.hbm [shape: f32[16,128], index: 7, kind: output, shape index: {}]  }
   0x1   :  { %13 = vsyncpa [#allocation6], 0 }
   0x2   :  { %14 = vsyncpa [#allocation9], 0 }
   0x3   :  { %15 = vsyncpa [#allocation4], 0  ;;  %s1922_s24 = smov [#allocation5]  }
   0x4   :  { %s33_s25 = sshll.u32 %s1922_s24, 4  ;;  %s34_s25 = int_to_ptr.vmem [resolvable:$true] %s33_s25 }
   0x5   :  { %s1822_s26 = scalar_lea.vmem %s34_s25, 16384  ;;  %p1827_p1 = scmp.lt.s32.totalorder %s34_s25, %s34_s25 }
   0x6   :  { %p1823_p0 = scmp.ne.s32.totalorder %s34_s25, %s1822_s26  ;;  %p1828_p2 = scmp.lt.s32.totalorder %s1822_s26, %s1822_s26 }
   0x8   :  { %p1829_p3 = por %p1828_p2, %p1827_p1 }
   0xa   :  { %p1830_p4 = pnand %p1829_p3, %p1823_p0 }
   0xc   :  { %1833 = shalt.err (!%p1830_p4)
}
   0xd   :  { %s1923_s27 = smov 128   ;;  %s1924_s28 = smov 8  }
   0xe   :  { %39 = dma.hbm_to_vmem [thread:$0]  %s2014_s1, 16384, %s34_s25, [#allocation6], %s1923_s27, %s1923_s27, %s1924_s28  }
   0xf   :  { %s1925_s8 = smov [#allocation2]  }
  0x10   :  { %s21_s9 = sshll.u32 %s1925_s8, 4  ;;  %s22_s9 = int_to_ptr.vmem [resolvable:$true] %s21_s9 }
  0x11   :  { %s1842_s10 = scalar_lea.vmem %s22_s9, 2048  ;;  %p1847_p6 = scmp.lt.s32.totalorder %s22_s9, %s22_s9 }
  0x12   :  { %p1843_p5 = scmp.ne.s32.totalorder %s22_s9, %s1842_s10  ;;  %p1848_p7 = scmp.lt.s32.totalorder %s1842_s10, %s1842_s10 }
  0x14   :  { %p1849_p8 = por %p1848_p7, %p1847_p6 }
  0x16   :  { %p1850_p9 = pnand %p1849_p8, %p1843_p5 }
  0x18   :  { %1853 = shalt.err (!%p1850_p9)
}
  0x19   :  { %s1926_s11 = smov 1024   ;;  %s1927_s12 = smov 64  }
  0x1a   :  { %27 = dma.hbm_to_vmem [thread:$0]  %s2013_s0, 2048, %s22_s9, [#allocation3], %s1926_s11, %s1926_s11, %s1927_s12  }
  0x1b   :  { %s1928_s15 = smov [#allocation7]   ;;  %s1929_s1 = smov [#allocation8]  }
  0x1c   :  { %s47_s16 = sshll.u32 %s1928_s15, 4  ;;  %s61_s17 = sshll.u32 %s1929_s1, 4  ;;  %s48_s16 = int_to_ptr.vmem [resolvable:$true] %s47_s16  ;;  %s62_s17 = int_to_ptr.vmem [resolvable:$true] %s61_s17 }
  0x1d   :  { %s1862_s18 = scalar_lea.vmem %s48_s16, 2048  ;;  %p1867_p11 = scmp.lt.s32.totalorder %s48_s16, %s48_s16 }
  0x1e   :  { %p1863_p10 = scmp.ne.s32.totalorder %s48_s16, %s1862_s18  ;;  %p1868_p12 = scmp.lt.s32.totalorder %s1862_s18, %s1862_s18 }
  0x20   :  { %p1869_p13 = por %p1868_p12, %p1867_p11 }
  0x22   :  { %p1870_p0 = pnand %p1869_p13, %p1863_p10 }
  0x24   :  { %1873 = shalt.err (!%p1870_p0)
}
  0x25   :  { %s1930_s19 = smov 4   ;;  %s1882_s22 = scalar_lea.vmem %s62_s17, 1024 }
  0x26   :  { %53 = dma.hbm_to_vmem [thread:$0]  %s2016_s3, 2048, %s48_s16, [#allocation6], %s1927_s12, %s1927_s12, %s1930_s19  }
  0x27   :  { %p1883_p1 = scmp.ne.s32.totalorder %s62_s17, %s1882_s22  ;;  %p1887_p2 = scmp.lt.s32.totalorder %s62_s17, %s62_s17 }
  0x28   :  { %p1888_p3 = scmp.lt.s32.totalorder %s1882_s22, %s1882_s22 }
  0x2a   :  { %p1889_p4 = por %p1888_p3, %p1887_p2 }
  0x2c   :  { %p1890_p5 = pnand %p1889_p4, %p1883_p1 }
  0x2e   :  { %1893 = shalt.err (!%p1890_p5)
}
  0x2f   :  { %67 = dma.hbm_to_vmem [thread:$0]  %s2018_s5, 1024, %s62_s17, [#allocation9], %s1927_s12, %s1927_s12, %s1930_s19  }
  0x30   :  { %1914 = dma.done.wait [#allocation3], 2048  }
  0x31   :  { %1915 = vsyncadd [#allocation3], 4294965248 }
  0x32   :  { %1916 = dma.done.wait [#allocation6], 18432  }
  0x33   :  { %1917 = vsyncadd [#allocation6], 4294948864 }
  0x34   :  { %1918 = dma.done.wait [#allocation9], 1024  }
  0x35   :  { %1919 = vsyncadd [#allocation9], 4294966272  ;;  %v1594_v0 = vld [vmem:[#allocation5 + $0x74] ss:$8 sps:$4 sm:$0xff]   ;;  %v1598_v2 = vld [vmem:[#allocation5 + $0x70] ss:$8 sps:$4 sm:$0xff]  }
  0x36   :  { %v1596_v1 = vld [vmem:[#allocation5 + $0x174] ss:$8 sps:$4 sm:$0xff]   ;;  %887 = vmatprep.subr.bf16.mxu0 %v1594_v0  ;;  %v1599_v3 = vld [vmem:[#allocation5 + $0x170] ss:$8 sps:$4 sm:$0xff]   ;;  %v1600_v4 = vld [vmem:[#allocation5 + $0x64] ss:$8 sps:$4 sm:$0xff]  }
  0x37   :  { %930 = vmatprep.subr.bf16.mxu1 %v1596_v1  ;;  %888 = vmatpush1.bf16.msra.mxu0 %v1598_v2  ;;  %v1602_v5 = vld [vmem:[#allocation5 + $0x164] ss:$8 sps:$4 sm:$0xff]   ;;  %v1604_v6 = vld [vmem:[#allocation5 + $0x60] ss:$8 sps:$4 sm:$0xff]   ;;  %v1606_v8 = vld [vmem:[#allocation5 + $0x54] ss:$8 sps:$4 sm:$0xff]  }
  0x38   :  { %931 = vmatpush1.bf16.msra.mxu1 %v1599_v3  ;;  %889 = vmatprep.subr.bf16.mxu0 %v1600_v4  ;;  %v1605_v7 = vld [vmem:[#allocation5 + $0x160] ss:$8 sps:$4 sm:$0xff]   ;;  %v1608_v9 = vld [vmem:[#allocation5 + $0x154] ss:$8 sps:$4 sm:$0xff]   ;;  %v1610_v10 = vld [vmem:[#allocation5 + $0x50] ss:$8 sps:$4 sm:$0xff]  }
  0x39   :  { %932 = vmatprep.subr.bf16.mxu1 %v1602_v5  ;;  %v1611_v11 = vld [vmem:[#allocation5 + $0x150] ss:$8 sps:$4 sm:$0xff]   ;;  %v1612_v12 = vld [vmem:[#allocation5 + $0x44] ss:$8 sps:$4 sm:$0xff]   ;;  %v1616_v14 = vld [vmem:[#allocation5 + $0x40] ss:$8 sps:$4 sm:$0xff]  }
  0x3a   :  { %v1614_v13 = vld [vmem:[#allocation5 + $0x144] ss:$8 sps:$4 sm:$0xff]   ;;  %v1617_v15 = vld [vmem:[#allocation5 + $0x140] ss:$8 sps:$4 sm:$0xff]   ;;  %v1618_v16 = vld [vmem:[#allocation5 + $0x34] ss:$8 sps:$4 sm:$0xff]  }
  0x3b   :  { %890 = vmatpush1.bf16.msra.mxu0 %v1604_v6  ;;  %v1620_v17 = vld [vmem:[#allocation5 + $0x134] ss:$8 sps:$4 sm:$0xff]   ;;  %v1622_v18 = vld [vmem:[#allocation5 + $0x30] ss:$8 sps:$4 sm:$0xff]   ;;  %v1624_v20 = vld [vmem:[#allocation5 + $0x24] ss:$8 sps:$4 sm:$0xff]  }
  0x3c   :  { %933 = vmatpush1.bf16.msra.mxu1 %v1605_v7  ;;  %891 = vmatprep.subr.bf16.mxu0 %v1606_v8  ;;  %v1623_v19 = vld [vmem:[#allocation5 + $0x130] ss:$8 sps:$4 sm:$0xff]   ;;  %v1626_v21 = vld [vmem:[#allocation5 + $0x124] ss:$8 sps:$4 sm:$0xff]   ;;  %v1628_v22 = vld [vmem:[#allocation5 + $0x20] ss:$8 sps:$4 sm:$0xff]  }
  0x3d   :  { %934 = vmatprep.subr.bf16.mxu1 %v1608_v9  ;;  %v1629_v23 = vld [vmem:[#allocation5 + $0x120] ss:$8 sps:$4 sm:$0xff]   ;;  %v1630_v24 = vld [vmem:[#allocation5 + $0x14] ss:$8 sps:$4 sm:$0xff]   ;;  %v1634_v26 = vld [vmem:[#allocation5 + $0x10] ss:$8 sps:$4 sm:$0xff]  }
  0x3e   :  { %v1632_v25 = vld [vmem:[#allocation5 + $0x114] ss:$8 sps:$4 sm:$0xff]   ;;  %v1635_v27 = vld [vmem:[#allocation5 + $0x110] ss:$8 sps:$4 sm:$0xff]   ;;  %v1636_v28 = vld [vmem:[#allocation5 + $0x4] ss:$8 sps:$4 sm:$0xff]  }
  0x3f   :  { %892 = vmatpush1.bf16.msra.mxu0 %v1610_v10  ;;  %v1638_v29 = vld [vmem:[#allocation5 + $0x104] ss:$8 sps:$4 sm:$0xff]   ;;  %v1640_v30 = vld [vmem:[#allocation5] ss:$8 sps:$4 sm:$0xff]   ;;  %v1642_v32 = vld [vmem:[#allocation5 + $0xf4] ss:$8 sps:$4 sm:$0xff]  }
  0x40   :  { %935 = vmatpush1.bf16.msra.mxu1 %v1611_v11  ;;  %893 = vmatprep.subr.bf16.mxu0 %v1612_v12  ;;  %v1641_v31 = vld [vmem:[#allocation5 + $0x100] ss:$8 sps:$4 sm:$0xff]   ;;  %v1644_v33 = vld [vmem:[#allocation5 + $0x1f4] ss:$8 sps:$4 sm:$0xff]   ;;  %v1646_v34 = vld [vmem:[#allocation5 + $0xf0] ss:$8 sps:$4 sm:$0xff]  }
  0x41   :  { %936 = vmatprep.subr.bf16.mxu1 %v1614_v13  ;;  %v1647_v35 = vld [vmem:[#allocation5 + $0x1f0] ss:$8 sps:$4 sm:$0xff]   ;;  %v1648_v36 = vld [vmem:[#allocation5 + $0xe4] ss:$8 sps:$4 sm:$0xff]   ;;  %v1652_v38 = vld [vmem:[#allocation5 + $0xe0] ss:$8 sps:$4 sm:$0xff]  }
  0x42   :  { %v1650_v37 = vld [vmem:[#allocation5 + $0x1e4] ss:$8 sps:$4 sm:$0xff]   ;;  %v1653_v39 = vld [vmem:[#allocation5 + $0x1e0] ss:$8 sps:$4 sm:$0xff]   ;;  %v1654_v40 = vld [vmem:[#allocation5 + $0xd4] ss:$8 sps:$4 sm:$0xff]  }
  0x43   :  { %894 = vmatpush1.bf16.msra.mxu0 %v1616_v14  ;;  %v1656_v41 = vld [vmem:[#allocation5 + $0x1d4] ss:$8 sps:$4 sm:$0xff]   ;;  %v1658_v42 = vld [vmem:[#allocation5 + $0xd0] ss:$8 sps:$4 sm:$0xff]   ;;  %v1660_v44 = vld [vmem:[#allocation5 + $0xc4] ss:$8 sps:$4 sm:$0xff]  }
  0x44   :  { %937 = vmatpush1.bf16.msra.mxu1 %v1617_v15  ;;  %895 = vmatprep.subr.bf16.mxu0 %v1618_v16  ;;  %v1659_v43 = vld [vmem:[#allocation5 + $0x1d0] ss:$8 sps:$4 sm:$0xff]   ;;  %v1662_v45 = vld [vmem:[#allocation5 + $0x1c4] ss:$8 sps:$4 sm:$0xff]   ;;  %v1664_v50 = vld [vmem:[#allocation5 + $0xc0] ss:$8 sps:$4 sm:$0xff]  }
  0x45   :  { %938 = vmatprep.subr.bf16.mxu1 %v1620_v17  ;;  %v84_v46 = vld [vmem:[#allocation2 + $0x8] sm:$0xff]  ;;  %v86_v48 = vld [vmem:[#allocation2 + $0x18] sm:$0xff]  ;;  %v83_v6 = vld [vmem:[#allocation2] sm:$0xff]  ;;  %vm1932_vm0 = vmmov 0  }
  0x46   :  { %v92_v47 = vld [vmem:[#allocation2 + $0x48] sm:$0xff]  ;;  %v94_v49 = vld [vmem:[#allocation2 + $0x58] sm:$0xff]  ;;  %v91_v7 = vld [vmem:[#allocation2 + $0x40] sm:$0xff] }
  0x47   :  { %896 = vmatpush1.bf16.msra.mxu0 %v1622_v18  ;;  %v1665_v51 = vld [vmem:[#allocation5 + $0x1c0] ss:$8 sps:$4 sm:$0xff]   ;;  %v1666_v52 = vld [vmem:[#allocation5 + $0xb4] ss:$8 sps:$4 sm:$0xff]   ;;  %v100_v53 = vpack.c.bf16 %v92_v47, %v84_v46  ;;  %v102_v54 = vpack.c.bf16 %v94_v49, %v86_v48  ;;  %v1670_v56 = vld [vmem:[#allocation5 + $0xb0] ss:$8 sps:$4 sm:$0xff]   ;;  %v99_v12 = vpack.c.bf16 %v91_v7, %v83_v6 }
  0x48   :  { %939 = vmatpush1.bf16.msra.mxu1 %v1623_v19  ;;  %897 = vmatprep.subr.bf16.mxu0 %v1624_v20  ;;  %v1668_v55 = vld [vmem:[#allocation5 + $0x1b4] ss:$8 sps:$4 sm:$0xff]   ;;  %v1671_v57 = vld [vmem:[#allocation5 + $0x1b0] ss:$8 sps:$4 sm:$0xff]   ;;  %v1672_v58 = vld [vmem:[#allocation5 + $0xa4] ss:$8 sps:$4 sm:$0xff]  }
  0x49   :  { %940 = vmatprep.subr.bf16.mxu1 %v1626_v21  ;;  %919 = vmatprep.mubr.bf16.mxu0 %v100_v53  ;;  %v1674_v59 = vld [vmem:[#allocation5 + $0x1a4] ss:$8 sps:$4 sm:$0xff]   ;;  %v1676_v60 = vld [vmem:[#allocation5 + $0xa0] ss:$8 sps:$4 sm:$0xff]   ;;  %v1678_v62 = vld [vmem:[#allocation5 + $0x94] ss:$8 sps:$4 sm:$0xff]  }
  0x4a   :  { %962 = vmatprep.mubr.bf16.mxu1 %v102_v54  ;;  %v1677_v61 = vld [vmem:[#allocation5 + $0x1a0] ss:$8 sps:$4 sm:$0xff]   ;;  %v1680_v63 = vld [vmem:[#allocation5 + $0x194] ss:$8 sps:$4 sm:$0xff]   ;;  %v1682_v0 = vld [vmem:[#allocation5 + $0x90] ss:$8 sps:$4 sm:$0xff]  }
  0x4b   :  { %898 = vmatpush1.bf16.msra.mxu0 %v1628_v22  ;;  %v1683_v1 = vld [vmem:[#allocation5 + $0x190] ss:$8 sps:$4 sm:$0xff]   ;;  %v1684_v2 = vld [vmem:[#allocation5 + $0x84] ss:$8 sps:$4 sm:$0xff]   ;;  %v1688_v4 = vld [vmem:[#allocation5 + $0x80] ss:$8 sps:$4 sm:$0xff]  }
  0x4c   :  { %941 = vmatpush1.bf16.msra.mxu1 %v1629_v23  ;;  %899 = vmatprep.subr.bf16.mxu0 %v1630_v24  ;;  %v1686_v3 = vld [vmem:[#allocation5 + $0x184] ss:$8 sps:$4 sm:$0xff]   ;;  %v1689_v5 = vld [vmem:[#allocation5 + $0x180] ss:$8 sps:$4 sm:$0xff]   ;;  %v85_v8 = vld [vmem:[#allocation2 + $0x10] sm:$0xff] }
  0x4d   :  { %942 = vmatprep.subr.bf16.mxu1 %v1632_v25  ;;  %v93_v9 = vld [vmem:[#allocation2 + $0x50] sm:$0xff]  ;;  %v1698_v16 = vld [vmem:[#allocation5 + $0x264] ss:$8 sps:$4 sm:$0xff]   ;;  %v1696_v18 = vld [vmem:[#allocation5 + $0x260] ss:$8 sps:$4 sm:$0xff]  }
  0x4e   :  { %v1692_v10 = vld [vmem:[#allocation5 + $0x274] ss:$8 sps:$4 sm:$0xff]   ;;  %v101_v13 = vpack.c.bf16 %v93_v9, %v85_v8  ;;  %v1690_v14 = vld [vmem:[#allocation5 + $0x270] ss:$8 sps:$4 sm:$0xff]   ;;  %v1701_v17 = vld [vmem:[#allocation5 + $0x364] ss:$8 sps:$4 sm:$0xff]  }
  0x4f   :  { %900 = vmatpush1.bf16.msra.mxu0 %v1634_v26  ;;  %v1695_v11 = vld [vmem:[#allocation5 + $0x374] ss:$8 sps:$4 sm:$0xff]   ;;  %v1693_v15 = vld [vmem:[#allocation5 + $0x370] ss:$8 sps:$4 sm:$0xff]   ;;  %v1699_v19 = vld [vmem:[#allocation5 + $0x360] ss:$8 sps:$4 sm:$0xff]  }
  0x50   :  { %943 = vmatpush1.bf16.msra.mxu1 %v1635_v27  ;;  %901 = vmatprep.subr.bf16.mxu0 %v1636_v28  ;;  %v1704_v20 = vld [vmem:[#allocation5 + $0x254] ss:$8 sps:$4 sm:$0xff]   ;;  %v1702_v22 = vld [vmem:[#allocation5 + $0x250] ss:$8 sps:$4 sm:$0xff]   ;;  %v1710_v24 = vld [vmem:[#allocation5 + $0x244] ss:$8 sps:$4 sm:$0xff]  }
  0x51   :  { %944 = vmatprep.subr.bf16.mxu1 %v1638_v29  ;;  %v1707_v21 = vld [vmem:[#allocation5 + $0x354] ss:$8 sps:$4 sm:$0xff]   ;;  %v1705_v23 = vld [vmem:[#allocation5 + $0x350] ss:$8 sps:$4 sm:$0xff]   ;;  %v1713_v25 = vld [vmem:[#allocation5 + $0x344] ss:$8 sps:$4 sm:$0xff]  }
  0x52   :  { %v1708_v26 = vld [vmem:[#allocation5 + $0x240] ss:$8 sps:$4 sm:$0xff]   ;;  %v1716_v28 = vld [vmem:[#allocation5 + $0x234] ss:$8 sps:$4 sm:$0xff]   ;;  %v1741_v53 = vld [vmem:[#allocation5 + $0x3f0] ss:$8 sps:$4 sm:$0xff]  }
  0x53   :  { %902 = vmatpush1.bf16.msra.mxu0 %v1640_v30  ;;  %v1711_v27 = vld [vmem:[#allocation5 + $0x340] ss:$8 sps:$4 sm:$0xff]   ;;  %v1719_v29 = vld [vmem:[#allocation5 + $0x334] ss:$8 sps:$4 sm:$0xff]   ;;  %v1714_v30 = vld [vmem:[#allocation5 + $0x230] ss:$8 sps:$4 sm:$0xff]  }
  0x54   :  { %945 = vmatpush1.bf16.msra.mxu1 %v1641_v31  ;;  %903 = vmatprep.subr.bf16.mxu0 %v1642_v32  ;;  %v1717_v31 = vld [vmem:[#allocation5 + $0x330] ss:$8 sps:$4 sm:$0xff]   ;;  %v1722_v32 = vld [vmem:[#allocation5 + $0x224] ss:$8 sps:$4 sm:$0xff]   ;;  %v1732_v47 = vld [vmem:[#allocation5 + $0x200] ss:$8 sps:$4 sm:$0xff]  }
  0x55   :  { %946 = vmatprep.subr.bf16.mxu1 %v1644_v33  ;;  %v1725_v33 = vld [vmem:[#allocation5 + $0x324] ss:$8 sps:$4 sm:$0xff]   ;;  %v98_v46 = vld [vmem:[#allocation2 + $0x78] sm:$0xff]  ;;  %v1735_v48 = vld [vmem:[#allocation5 + $0x300] ss:$8 sps:$4 sm:$0xff]  }
  0x56   :  { %v1746_v54 = vld [vmem:[#allocation5 + $0x2e4] ss:$8 sps:$4 sm:$0xff]   ;;  %v1768_v8 = vld [vmem:[#allocation5 + $0x2a0] ss:$8 sps:$4 sm:$0xff]  }
  0x57   :  { %904 = vmatpush2.bf16.msra.mxu0 %v1646_v34  ;;  %v1720_v34 = vld [vmem:[#allocation5 + $0x220] ss:$8 sps:$4 sm:$0xff]   ;;  %v1770_v6 = vld [vmem:[#allocation5 + $0x2a4] ss:$8 sps:$4 sm:$0xff]  }
  0x58   :  { %947 = vmatpush2.bf16.msra.mxu1 %v1647_v35  ;;  %905 = vmatprep.subr.bf16.mxu0 %v1648_v36  ;;  %v1723_v35 = vld [vmem:[#allocation5 + $0x320] ss:$8 sps:$4 sm:$0xff]   ;;  %v1728_v36 = vld [vmem:[#allocation5 + $0x214] ss:$8 sps:$4 sm:$0xff]   ;;  %v1773_v7 = vld [vmem:[#allocation5 + $0x3a4] ss:$8 sps:$4 sm:$0xff]  }
  0x59   :  { %948 = vmatprep.subr.bf16.mxu1 %v1650_v37  ;;  %v1731_v37 = vld [vmem:[#allocation5 + $0x314] ss:$8 sps:$4 sm:$0xff]   ;;  %v1771_v9 = vld [vmem:[#allocation5 + $0x3a0] ss:$8 sps:$4 sm:$0xff]  }
  0x5b   :  { %906 = vmatpush2.bf16.msra.mxu0 %v1652_v38  ;;  %v1726_v38 = vld [vmem:[#allocation5 + $0x210] ss:$8 sps:$4 sm:$0xff]  }
  0x5c   :  { %949 = vmatpush2.bf16.msra.mxu1 %v1653_v39  ;;  %907 = vmatprep.subr.bf16.mxu0 %v1654_v40  ;;  %v1729_v39 = vld [vmem:[#allocation5 + $0x310] ss:$8 sps:$4 sm:$0xff]   ;;  %v88_v40 = vld [vmem:[#allocation2 + $0x28] sm:$0xff] }
  0x5d   :  { %950 = vmatprep.subr.bf16.mxu1 %v1656_v41  ;;  %v96_v41 = vld [vmem:[#allocation2 + $0x68] sm:$0xff] }
  0x5f   :  { %908 = vmatpush2.bf16.msra.mxu0 %v1658_v42  ;;  %v90_v42 = vld [vmem:[#allocation2 + $0x38] sm:$0xff] }
  0x60   :  { %951 = vmatpush2.bf16.msra.mxu1 %v1659_v43  ;;  %909 = vmatprep.subr.bf16.mxu0 %v1660_v44  ;;  %v1734_v43 = vld [vmem:[#allocation5 + $0x204] ss:$8 sps:$4 sm:$0xff]   ;;  %v106_v49 = vpack.c.bf16 %v98_v46, %v90_v42  ;;  %v237_v42 = vlaneseq }
  0x61   :  { %952 = vmatprep.subr.bf16.mxu1 %v1662_v45  ;;  %v1737_v44 = vld [vmem:[#allocation5 + $0x304] ss:$8 sps:$4 sm:$0xff]   ;;  %v104_v45 = vpack.c.bf16 %v96_v41, %v88_v40  ;;  %v1802_v40 = vld [vmem:[#allocation8 + $0x38] sm:$0xff]   ;;  %v1931_v41 = vmov 0.0  }
  0x63   :  { %910 = vmatpush2.bf16.msra.mxu0 %v1664_v50  ;;  %v1740_v50 = vld [vmem:[#allocation5 + $0x2f4] ss:$8 sps:$4 sm:$0xff]  }
  0x64   :  { %953 = vmatpush2.bf16.msra.mxu1 %v1665_v51  ;;  %911 = vmatprep.subr.bf16.mxu0 %v1666_v52  ;;  %v1743_v51 = vld [vmem:[#allocation5 + $0x3f4] ss:$8 sps:$4 sm:$0xff]   ;;  %v1738_v52 = vld [vmem:[#allocation5 + $0x2f0] ss:$8 sps:$4 sm:$0xff]  }
  0x65   :  { %954 = vmatprep.subr.bf16.mxu1 %v1668_v55  ;;  %v1749_v55 = vld [vmem:[#allocation5 + $0x3e4] ss:$8 sps:$4 sm:$0xff]  }
  0x67   :  { %912 = vmatpush2.bf16.msra.mxu0 %v1670_v56  ;;  %v1744_v56 = vld [vmem:[#allocation5 + $0x2e0] ss:$8 sps:$4 sm:$0xff]  }
  0x68   :  { %955 = vmatpush2.bf16.msra.mxu1 %v1671_v57  ;;  %913 = vmatprep.subr.bf16.mxu0 %v1672_v58  ;;  %v1747_v57 = vld [vmem:[#allocation5 + $0x3e0] ss:$8 sps:$4 sm:$0xff]   ;;  %v1752_v58 = vld [vmem:[#allocation5 + $0x2d4] ss:$8 sps:$4 sm:$0xff]  }
  0x69   :  { %956 = vmatprep.subr.bf16.mxu1 %v1674_v59  ;;  %v1755_v59 = vld [vmem:[#allocation5 + $0x3d4] ss:$8 sps:$4 sm:$0xff]  }
  0x6b   :  { %914 = vmatpush2.bf16.msra.mxu0 %v1676_v60  ;;  %v1750_v60 = vld [vmem:[#allocation5 + $0x2d0] ss:$8 sps:$4 sm:$0xff]  }
  0x6c   :  { %957 = vmatpush2.bf16.msra.mxu1 %v1677_v61  ;;  %915 = vmatprep.subr.bf16.mxu0 %v1678_v62  ;;  %v1753_v61 = vld [vmem:[#allocation5 + $0x3d0] ss:$8 sps:$4 sm:$0xff]   ;;  %v1758_v62 = vld [vmem:[#allocation5 + $0x2c4] ss:$8 sps:$4 sm:$0xff]  }
  0x6d   :  { %958 = vmatprep.subr.bf16.mxu1 %v1680_v63  ;;  %v1761_v63 = vld [vmem:[#allocation5 + $0x3c4] ss:$8 sps:$4 sm:$0xff]  }
  0x6f   :  { %916 = vmatpush2.bf16.msra.mxu0 %v1682_v0  ;;  %v1756_v0 = vld [vmem:[#allocation5 + $0x2c0] ss:$8 sps:$4 sm:$0xff]  }
  0x70   :  { %959 = vmatpush2.bf16.msra.mxu1 %v1683_v1  ;;  %917 = vmatprep.subr.bf16.mxu0 %v1684_v2  ;;  %v1759_v1 = vld [vmem:[#allocation5 + $0x3c0] ss:$8 sps:$4 sm:$0xff]   ;;  %v1764_v2 = vld [vmem:[#allocation5 + $0x2b4] ss:$8 sps:$4 sm:$0xff]  }
  0x71   :  { %960 = vmatprep.subr.bf16.mxu1 %v1686_v3  ;;  %v1767_v3 = vld [vmem:[#allocation5 + $0x3b4] ss:$8 sps:$4 sm:$0xff]  }
  0x73   :  { %918 = vmatpush2.bf16.msra.mxu0 %v1688_v4  ;;  %v1762_v4 = vld [vmem:[#allocation5 + $0x2b0] ss:$8 sps:$4 sm:$0xff]  }
  0x74   :  { %961 = vmatpush2.bf16.msra.mxu1 %v1689_v5  ;;  %973 = vmatprep.subr.bf16.mxu0 %v1692_v10  ;;  %v1765_v5 = vld [vmem:[#allocation5 + $0x3b0] ss:$8 sps:$4 sm:$0xff]   ;;  %v1776_v10 = vld [vmem:[#allocation5 + $0x294] ss:$8 sps:$4 sm:$0xff]  }
  0x75   :  { %1016 = vmatprep.subr.bf16.mxu1 %v1695_v11  ;;  %v1779_v11 = vld [vmem:[#allocation5 + $0x394] ss:$8 sps:$4 sm:$0xff]  }
  0x76   :  { %920 = vmatmul.mubr.bf16.vlgmr.msra.gmra.mxu0 %v99_v12  ;;  %v1774_v12 = vld [vmem:[#allocation5 + $0x290] ss:$8 sps:$4 sm:$0xff]  }
  0x77   :  { %963 = vmatmul.mubr.bf16.vlgmr.msra.gmra.mxu1 %v101_v13  ;;  %974 = vmatpush1.bf16.msra.mxu0 %v1690_v14  ;;  %v1777_v13 = vld [vmem:[#allocation5 + $0x390] ss:$8 sps:$4 sm:$0xff]   ;;  %v1782_v14 = vld [vmem:[#allocation5 + $0x284] ss:$8 sps:$4 sm:$0xff]  }
  0x78   :  { %1017 = vmatpush1.bf16.msra.mxu1 %v1693_v15  ;;  %975 = vmatprep.subr.bf16.mxu0 %v1698_v16  ;;  %v1785_v15 = vld [vmem:[#allocation5 + $0x384] ss:$8 sps:$4 sm:$0xff]   ;;  %v1780_v16 = vld [vmem:[#allocation5 + $0x280] ss:$8 sps:$4 sm:$0xff]  }
  0x79   :  { %1018 = vmatprep.subr.bf16.mxu1 %v1701_v17  ;;  %1005 = vmatprep.mubr.bf16.mxu0 %v104_v45  ;;  %v1783_v17 = vld [vmem:[#allocation5 + $0x380] ss:$8 sps:$4 sm:$0xff]  }
  0x7a   :  { %1048 = vmatprep.mubr.bf16.mxu1 %v106_v49 }
  0x7b   :  { %976 = vmatpush1.bf16.msra.mxu0 %v1696_v18  ;;  %v87_v18 = vld [vmem:[#allocation2 + $0x20] sm:$0xff] }
  0x7c   :  { %1019 = vmatpush1.bf16.msra.mxu1 %v1699_v19  ;;  %977 = vmatprep.subr.bf16.mxu0 %v1704_v20  ;;  %v95_v19 = vld [vmem:[#allocation2 + $0x60] sm:$0xff]  ;;  %v89_v20 = vld [vmem:[#allocation2 + $0x30] sm:$0xff] }
  0x7d   :  { %1020 = vmatprep.subr.bf16.mxu1 %v1707_v21  ;;  %v97_v21 = vld [vmem:[#allocation2 + $0x70] sm:$0xff] }
  0x7f   :  { %978 = vmatpush1.bf16.msra.mxu0 %v1702_v22  ;;  %v103_v22 = vpack.c.bf16 %v95_v19, %v87_v18 }
  0x80   :  { %1021 = vmatpush1.bf16.msra.mxu1 %v1705_v23  ;;  %979 = vmatprep.subr.bf16.mxu0 %v1710_v24  ;;  %v105_v23 = vpack.c.bf16 %v97_v21, %v89_v20  ;;  %v1786_v24 = vld [vmem:[#allocation7 + $0x78] sm:$0xff]  }
  0x81   :  { %1022 = vmatprep.subr.bf16.mxu1 %v1713_v25  ;;  %v1787_v25 = vld [vmem:[#allocation7 + $0x38] sm:$0xff]  }
  0x83   :  { %980 = vmatpush1.bf16.msra.mxu0 %v1708_v26  ;;  %v1788_v26 = vld [vmem:[#allocation7 + $0x70] sm:$0xff]  }
  0x84   :  { %1023 = vmatpush1.bf16.msra.mxu1 %v1711_v27  ;;  %981 = vmatprep.subr.bf16.mxu0 %v1716_v28  ;;  %v1789_v27 = vld [vmem:[#allocation7 + $0x30] sm:$0xff]   ;;  %v1790_v28 = vld [vmem:[#allocation7 + $0x68] sm:$0xff]  }
  0x85   :  { %1024 = vmatprep.subr.bf16.mxu1 %v1719_v29  ;;  %v1791_v29 = vld [vmem:[#allocation7 + $0x28] sm:$0xff]  }
  0x87   :  { %982 = vmatpush1.bf16.msra.mxu0 %v1714_v30  ;;  %v1792_v30 = vld [vmem:[#allocation7 + $0x60] sm:$0xff]  }
  0x88   :  { %1025 = vmatpush1.bf16.msra.mxu1 %v1717_v31  ;;  %983 = vmatprep.subr.bf16.mxu0 %v1722_v32  ;;  %v1793_v31 = vld [vmem:[#allocation7 + $0x20] sm:$0xff]   ;;  %v1794_v32 = vld [vmem:[#allocation7 + $0x58] sm:$0xff]  }
  0x89   :  { %1026 = vmatprep.subr.bf16.mxu1 %v1725_v33  ;;  %v1795_v33 = vld [vmem:[#allocation7 + $0x18] sm:$0xff]  }
  0x8b   :  { %984 = vmatpush1.bf16.msra.mxu0 %v1720_v34  ;;  %v1796_v34 = vld [vmem:[#allocation7 + $0x50] sm:$0xff]  }
  0x8c   :  { %1027 = vmatpush1.bf16.msra.mxu1 %v1723_v35  ;;  %985 = vmatprep.subr.bf16.mxu0 %v1728_v36  ;;  %v1797_v35 = vld [vmem:[#allocation7 + $0x10] sm:$0xff]   ;;  %v1798_v36 = vld [vmem:[#allocation7 + $0x48] sm:$0xff]  }
  0x8d   :  { %1028 = vmatprep.subr.bf16.mxu1 %v1731_v37  ;;  %v1799_v37 = vld [vmem:[#allocation7 + $0x8] sm:$0xff]  }
  0x8f   :  { %986 = vmatpush1.bf16.msra.mxu0 %v1726_v38  ;;  %v1800_v38 = vld [vmem:[#allocation7 + $0x40] sm:$0xff]  }
  0x90   :  { %1029 = vmatpush1.bf16.msra.mxu1 %v1729_v39  ;;  %987 = vmatprep.subr.bf16.mxu0 %v1734_v43  ;;  %v1801_v39 = vld [vmem:[#allocation7] sm:$0xff]   ;;  %v238_v43 = vshrl.u32 %v237_v42, 7 }
  0x91   :  { %1030 = vmatprep.subr.bf16.mxu1 %v1737_v44 }
  0x92   :  { %v243_v46 = vsub.s32 1, %v238_v43 }
  0x93   :  { %988 = vmatpush1.bf16.msra.mxu0 %v1732_v47  ;;  %v235_v47 = vld [vmem:[%s2015_s2] sm:$0x3] }
  0x94   :  { %1031 = vmatpush1.bf16.msra.mxu1 %v1735_v48  ;;  %989 = vmatprep.subr.bf16.mxu0 %v1740_v50  ;;  %v239_v48 = vsub.s32 0, %v238_v43 }
  0x95   :  { %1032 = vmatprep.subr.bf16.mxu1 %v1743_v51  ;;  %v244_v51 = vrot.slane %v235_v47, %v243_v46 }
  0x97   :  { %990 = vmatpush2.bf16.msra.mxu0 %v1738_v52  ;;  %v240_v52 = vrot.slane %v235_v47, %v239_v48 }
  0x98   :  { %1033 = vmatpush2.bf16.msra.mxu1 %v1741_v53  ;;  %991 = vmatprep.subr.bf16.mxu0 %v1746_v54 }
  0x99   :  { %1034 = vmatprep.subr.bf16.mxu1 %v1749_v55 }
  0x9b   :  { %992 = vmatpush2.bf16.msra.mxu0 %v1744_v56 }
  0x9c   :  { %1035 = vmatpush2.bf16.msra.mxu1 %v1747_v57  ;;  %993 = vmatprep.subr.bf16.mxu0 %v1752_v58 }
  0x9d   :  { %1036 = vmatprep.subr.bf16.mxu1 %v1755_v59 }
  0x9f   :  { %994 = vmatpush2.bf16.msra.mxu0 %v1750_v60 }
  0xa0   :  { %1037 = vmatpush2.bf16.msra.mxu1 %v1753_v61  ;;  %995 = vmatprep.subr.bf16.mxu0 %v1758_v62 }
  0xa1   :  { %1038 = vmatprep.subr.bf16.mxu1 %v1761_v63 }
  0xa3   :  { %996 = vmatpush2.bf16.msra.mxu0 %v1756_v0 }
  0xa4   :  { %1039 = vmatpush2.bf16.msra.mxu1 %v1759_v1  ;;  %997 = vmatprep.subr.bf16.mxu0 %v1764_v2 }
  0xa5   :  { %1040 = vmatprep.subr.bf16.mxu1 %v1767_v3 }
  0xa7   :  { %998 = vmatpush2.bf16.msra.mxu0 %v1762_v4 }
  0xa8   :  { %1041 = vmatpush2.bf16.msra.mxu1 %v1765_v5  ;;  %999 = vmatprep.subr.bf16.mxu0 %v1770_v6 }
  0xa9   :  { %1042 = vmatprep.subr.bf16.mxu1 %v1773_v7 }
  0xab   :  { %1000 = vmatpush2.bf16.msra.mxu0 %v1768_v8 }
  0xac   :  { %1043 = vmatpush2.bf16.msra.mxu1 %v1771_v9  ;;  %1001 = vmatprep.subr.bf16.mxu0 %v1776_v10 }
  0xad   :  { %1044 = vmatprep.subr.bf16.mxu1 %v1779_v11 }
  0xaf   :  { %1002 = vmatpush2.bf16.msra.mxu0 %v1774_v12 }
  0xb0   :  { %1045 = vmatpush2.bf16.msra.mxu1 %v1777_v13  ;;  %1003 = vmatprep.subr.bf16.mxu0 %v1782_v14 }
  0xb1   :  { %1046 = vmatprep.subr.bf16.mxu1 %v1785_v15 }
  0xb3   :  { %1004 = vmatpush2.bf16.msra.mxu0 %v1780_v16 }
  0xb4   :  { %1047 = vmatpush2.bf16.msra.mxu1 %v1783_v17  ;;  %1531 = vmatprep.subr.bf16.mxu0 %v1786_v24  ;;  %v1804_v24 = vld [vmem:[#allocation8 + $0x28] sm:$0xff]  }
  0xb5   :  { %1562 = vmatprep.subr.bf16.mxu1 %v1931_v41 }
  0xb6   :  { %1006 = vmatmul.mubr.bf16.vlgmr.msra.gmra.mxu0 %v103_v22 }
  0xb7   :  { %1049 = vmatmul.mubr.bf16.vlgmr.msra.gmra.mxu1 %v105_v23  ;;  %1532 = vmatpush3.bf16.msra.mxu0 %v1787_v25  ;;  %v1803_v23 = vld [vmem:[#allocation8 + $0x30] sm:$0xff]   ;;  %v1805_v25 = vld [vmem:[#allocation8 + $0x20] sm:$0xff]  }
  0xb8   :  { %1533 = vmatprep.subr.bf16.mxu0 %v1788_v26  ;;  %1563 = vmatpush3.bf16.msra.mxu1 %v1802_v40  ;;  %v1806_v26 = vld [vmem:[#allocation8 + $0x18] sm:$0xff]  }
  0xb9   :  { %1564 = vmatprep.subr.bf16.mxu1 %v1931_v41  ;;  %1578 = vmatprep.mubr.msk.bf16.mxu1 %vm1932_vm0, %v1931_v41 }
  0xbb   :  { %1534 = vmatpush3.bf16.msra.mxu0 %v1789_v27  ;;  %v1807_v27 = vld [vmem:[#allocation8 + $0x10] sm:$0xff]  }
  0xbc   :  { %1535 = vmatprep.subr.bf16.mxu0 %v1790_v28  ;;  %1565 = vmatpush3.bf16.msra.mxu1 %v1803_v23  ;;  %v1808_v28 = vld [vmem:[#allocation8 + $0x8] sm:$0xff]  }
  0xbd   :  { %1566 = vmatprep.subr.bf16.mxu1 %v1931_v41 }
  0xbf   :  { %1536 = vmatpush3.bf16.msra.mxu0 %v1791_v29  ;;  %v1809_v29 = vld [vmem:[#allocation8] sm:$0xff]  }
  0xc0   :  { %1537 = vmatprep.subr.bf16.mxu0 %v1792_v30  ;;  %1567 = vmatpush3.bf16.msra.mxu1 %v1804_v24 }
  0xc1   :  { %1568 = vmatprep.subr.bf16.mxu1 %v1931_v41 }
  0xc3   :  { %1538 = vmatpush3.bf16.msra.mxu0 %v1793_v31 }
  0xc4   :  { %1539 = vmatprep.subr.bf16.mxu0 %v1794_v32  ;;  %1569 = vmatpush3.bf16.msra.mxu1 %v1805_v25  ;;  %v1505_v32 = vld [vmem:[%s2017_s4] ss:$0 sm:$0xff]  ;;  %s1933_s4 = smov [#allocation10]  }
  0xc5   :  { %1570 = vmatprep.subr.bf16.mxu1 %v1931_v41  ;;  %s1363_s29 = sshll.u32 %s1933_s4, 4  ;;  %s1364_s29 = int_to_ptr.vmem [resolvable:$true] %s1363_s29 }
  0xc6   :  { %s1894_s30 = scalar_lea.vmem %s1364_s29, 256  ;;  %p1899_p7 = scmp.lt.s32.totalorder %s1364_s29, %s1364_s29 }
  0xc7   :  { %1540 = vmatpush3.bf16.msra.mxu0 %v1795_v33  ;;  %p1895_p6 = scmp.ne.s32.totalorder %s1364_s29, %s1894_s30  ;;  %p1900_p8 = scmp.lt.s32.totalorder %s1894_s30, %s1894_s30 }
  0xc8   :  { %1541 = vmatprep.subr.bf16.mxu0 %v1796_v34  ;;  %1571 = vmatpush3.bf16.msra.mxu1 %v1806_v26 }
  0xc9   :  { %1572 = vmatprep.subr.bf16.mxu1 %v1931_v41  ;;  %p1901_p9 = por %p1900_p8, %p1899_p7 }
  0xcb   :  { %1542 = vmatpush3.bf16.msra.mxu0 %v1797_v35  ;;  %p1902_p10 = pnand %p1901_p9, %p1895_p6 }
  0xcc   :  { %1543 = vmatprep.subr.bf16.mxu0 %v1798_v36  ;;  %1573 = vmatpush3.bf16.msra.mxu1 %v1807_v27 }
  0xcd   :  { %1574 = vmatprep.subr.bf16.mxu1 %v1931_v41 }
  0xcf   :  { %1544 = vmatpush3.bf16.msra.mxu0 %v1799_v37 }
  0xd0   :  { %1545 = vmatprep.subr.bf16.mxu0 %v1800_v38  ;;  %1575 = vmatpush3.bf16.msra.mxu1 %v1808_v28 }
  0xd1   :  { %1576 = vmatprep.subr.bf16.mxu1 %v1931_v41  ;;  %v1522_v41 = vld [vmem:[%s2019_s6] ss:$0 sm:$0xff] }
  0xd3   :  { %1546 = vmatpush3.bf16.msra.mxu0 %v1801_v39 }
  0xd4   :  { %1577 = vmatpush3.bf16.msra.mxu1 %v1809_v29 }
 0x136   :  { %v921_v44 = vpop.f32.mrf.mxu0 }
 0x137   :  { %v964_v45 = vpop.f32.mrf.mxu1  ;;  %v922_v56 = vadd.f32 %v921_v44, %v240_v52 }
 0x138   :  { %v923_v49 = vpop.f32.mrf.mxu0 }
 0x139   :  { %v966_v50 = vpop.f32.mrf.mxu1  ;;  %v924_v55 = vadd.f32 %v923_v49, %v244_v51  ;;  %v965_v0 = vadd.f32 %v964_v45, %v922_v56 }
 0x13a   :  { %v925_v53 = vpop.f32.mrf.mxu0 }
 0x13b   :  { %v968_v54 = vpop.f32.mrf.mxu1  ;;  %v926_v59 = vadd.f32 %v925_v53, %v240_v52  ;;  %v967_v62 = vadd.f32 %v966_v50, %v924_v55 }
 0x13c   :  { %v927_v57 = vpop.f32.mrf.mxu0 }
 0x13d   :  { %v970_v58 = vpop.f32.mrf.mxu1  ;;  %v928_v63 = vadd.f32 %v927_v57, %v244_v51  ;;  %v969_v3 = vadd.f32 %v968_v54, %v926_v59 }
 0x13f   :  { %v971_v8 = vadd.f32 %v970_v58, %v928_v63 }
 0x176   :  { %v1007_v60 = vpop.f32.mrf.mxu0 }
 0x177   :  { %v1050_v61 = vpop.f32.mrf.mxu1  ;;  %v1008_v5 = vadd.f32 %v1007_v60, %v965_v0 }
 0x178   :  { %v1009_v1 = vpop.f32.mrf.mxu0 }
 0x179   :  { %v1052_v2 = vpop.f32.mrf.mxu1  ;;  %v1010_v4 = vadd.f32 %v1009_v1, %v967_v62  ;;  %v1051_v14 = vadd.f32 %v1050_v61, %v1008_v5 }
 0x17a   :  { %v1011_v6 = vpop.f32.mrf.mxu0 }
 0x17b   :  { %v1054_v7 = vpop.f32.mrf.mxu1  ;;  %v1012_v9 = vadd.f32 %v1011_v6, %v969_v3  ;;  %v1053_v11 = vadd.f32 %v1052_v2, %v1010_v4  ;;  %v1059_v20 = vmax.f32 %v1051_v14, 0.0 }
 0x17c   :  { %v1013_v10 = vpop.f32.mrf.mxu0 }
 0x17d   :  { %v1055_v12 = vadd.f32 %v1054_v7, %v1012_v9  ;;  %v1014_v13 = vadd.f32 %v1013_v10, %v971_v8  ;;  %v1056_v15 = vpop.f32.mrf.mxu1  ;;  %v1060_v18 = vmax.f32 %v1053_v11, 0.0 }
 0x17f   :  { %v1057_v16 = vadd.f32 %v1056_v15, %v1014_v13  ;;  %v1061_v17 = vmax.f32 %v1055_v12, 0.0 }
 0x181   :  { %v1062_v19 = vmax.f32 %v1057_v16, 0.0  ;;  %v1063_v22 = vpack.c.bf16 %v1061_v17, %v1059_v20 }
 0x183   :  { %v1064_v21 = vpack.c.bf16 %v1062_v19, %v1060_v18 }
 0x185   :  { %1232 = vmatprep.mubr.bf16.mxu0 %v1064_v21 }
 0x186   :  { %1233 = vmatmul.mubr.bf16.vlgmr.msra.gmra.mxu0 %v1063_v22 }
 0x246   :  { %v1547_v30 = vpop.f32.mrf.mxu0 }
 0x248   :  { %v1548_v31 = vpop.f32.mrf.mxu0 }
 0x249   :  { %v1549_v33 = vadd.f32 %v1548_v31, %v1547_v30 }
 0x24a   :  { %v1550_v34 = vpop.f32.mrf.mxu0 }
 0x24b   :  { %v1235_v35 = vadd.f32 %v1549_v33, %v1505_v32 }
 0x24c   :  { %v1551_v36 = vpop.f32.mrf.mxu0 }
 0x24d   :  { %v1552_v37 = vadd.f32 %v1551_v36, %v1550_v34  ;;  %1810 = vtanh.f32 %v1235_v35 }
 0x24f   :  { %v1238_v38 = vadd.f32 %v1552_v37, %v1505_v32 }
 0x251   :  { %1812 = vtanh.f32 %v1238_v38 }
 0x25a   :  { %v1811_v39 = vpop.eup %1810 }
 0x25e   :  { %v1813_v40 = vpop.eup %1812 }
 0x25f   :  { %v1243_v42 = vpack.c.bf16 %v1813_v40, %v1811_v39 }
 0x261   :  { %1579 = vmatmul.mubr.bf16.vlgmr.msra.gmra.mxu1 %v1243_v42 }
 0x321   :  { %v1349_v43 = vpop.f32.mrf.mxu1 }
 0x322   :  { %v1350_v44 = vadd.f32 %v1522_v41, %v1349_v43 }
 0x323   :  { %v1580_v45 = vpop.f32.mrf.mxu1 }
 0x324   :  { %1356 = vst [vmem:[#allocation10] sm:$0xff] %v1350_v44 }
 0x325   :  { %v1352_v46 = vpop.f32.mrf.mxu1 }
 0x326   :  { %v1353_v47 = vadd.f32 %v1522_v41, %v1352_v46 }
 0x327   :  { %v1581_v48 = vpop.f32.mrf.mxu1 }
 0x328   :  { %1357 = vst [vmem:[#allocation10 + $0x8] sm:$0xff] %v1353_v47 }
 0x329   :  { %1905 = shalt.err (!%p1902_p10)
}
 0x32a   :  { %1369 = dma.vmem_to_hbm [thread:$0]  %s1364_s29, 256, %s2020_s7, [#allocation4], %s1923_s27, %s1923_s27, %s1924_s28  }
 0x32b   :  { %1920 = dma.done.wait [#allocation4], 256  }
 0x32c   :  { %1921 = vsyncadd [#allocation4], 4294967040 }
 0x32d   :  { %1373 = vsyncpa [#allocation3], 1 }
 0x32e   :  { %1374 = vsyncpa [#allocation6], 1 }
 0x32f   :  { %1375 = vsyncpa [#allocation9], 1 }
 0x330   :  { %1376 = vsyncpa [#allocation4], 1 }

</bundles_post_ra>
